<compile_context>
chip_gen: v7x
topology: tpu7x:2x2x1
jax: 0.10.0
libtpu: 0.0.40
codegen_flags: <defaults>
</compile_context>

<pallas_src>
import functools

import jax
import jax.numpy as jnp
from jax.experimental import pallas as pl
from jax.experimental.pallas import tpu as pltpu


def dilated_residual_block_kernel(x_ref, m_ref, wstk_ref, bdil_ref, b1_ref,
                                  o_ref, *, block_size, ksize, dilation, pad,
                                  batch_tile):
    """Fused kernel for one (batch_tile, C, L) tile in the native layout.

    x_ref:    (bt, C, L)   residual input
    m_ref:    (bt, 1, L)   mask (channel 0 of the mask tensor)
    wstk_ref: (B, C, K*C)  dilated conv weights, taps stacked into the
                           contraction dim; the LAST block is pre-folded with
                           the 1x1 conv (W1 @ W_last) in the wrapper.
    bdil_ref: (B, C, 1)    dilated conv biases (last one folded with W1)
    b1_ref:   (C, 1)       1x1 conv bias
    o_ref:    (bt, C, L)   output
    """
    C = x_ref.shape[1]
    L = x_ref.shape[2]
    f32 = jnp.float32

    # Tap-validity gates (the Conv1d zero padding).  Identical for every
    # sequence and every residual block -> build once, already broadcast to
    # (C, L) so the loops below never re-materialize broadcasts.
    pos = jax.lax.broadcasted_iota(jnp.int32, (C, L), 1)
    gates = []
    for t in range(ksize):
        off = t * dilation - pad
        if off == 0:
            gates.append(None)                       # center tap: always valid
        else:
            gates.append(jnp.logical_and(pos + off >= 0, pos + off < L))

    # Hoist weight/bias loads (and their lane broadcasts) out of both loops.
    w_stk = [wstk_ref[b].astype(f32) for b in range(block_size)]
    b_stk = [jnp.broadcast_to(bdil_ref[b].astype(f32), (C, L))
             for b in range(block_size)]
    b1 = jnp.broadcast_to(b1_ref[...].astype(f32), (C, L))

    for bi in range(batch_tile):                     # small static unroll
        x = x_ref[bi].astype(f32)                                    # (C, L)
        m = jnp.broadcast_to(m_ref[bi].astype(f32), (C, L))          # (C, L)

        cur = x
        for b in range(block_size):
            # X_stack[t*C + ci, l] = cur[ci, l + t*dilation - pad], zero
            # outside [0, L).  Lane shifts via the XLU (pltpu.roll, positive
            # axis); gating with where so wrapped values can never leak.
            taps = []
            for t in range(ksize):
                off = t * dilation - pad
                if off == 0:
                    taps.append(cur)
                else:
                    shifted = pltpu.roll(cur, shift=(-off) % L, axis=1)
                    taps.append(jnp.where(gates[t], shifted, 0.0))
            x_stack = jnp.concatenate(taps, axis=0) if ksize > 1 else taps[0]

            # One MXU push per residual block: (C, K*C) @ (K*C, L).
            acc = jnp.dot(w_stk[b], x_stack, preferred_element_type=f32)
            cur = (acc + b_stk[b]) * m

        # 1x1 conv was folded into the last block's weights in the wrapper,
        # so the epilogue is just bias + residual + final mask.
        # TODO(synk): nn.Dropout() treated as identity (eval mode); training
        # dropout would use pltpu.prng_seed / pltpu.prng_random_bits.
        o_ref[bi] = ((x + cur + b1) * m).astype(o_ref.dtype)


def dilated_residual_block(x, mask, w_dil, b_dil, w1, b1, *, kernel_size,
                           dilation, block_size, batch_tile=None):
    """x: (N, C, L), mask: (N, M, L), w_dil: (B, C, C, K), b_dil: (B, C),
       w1: (C, C, 1), b1: (C,).  Returns (N, C, L)."""
    N, C, L = x.shape
    pad = ((kernel_size - 1) // 2) * dilation

    # ---- batch tiling over the native (N, C, L) layout ----------------------
    # Each grid step DMAs one contiguous (batch_tile, C, L) slab; x and the
    # output each make exactly one HBM pass.  Target ~0.5 MiB per step to
    # amortize the ~0.35 us grid-step overhead; tiny problems -> grid=1.
    if batch_tile is None:
        seq_bytes = C * L * x.dtype.itemsize
        target_bytes = 512 * 1024
        batch_tile = max(1, min(N, target_bytes // max(seq_bytes, 1)))
        batch_tile = min(batch_tile, 16)     # bound the static in-kernel unroll
    batch_tile = int(max(1, min(batch_tile, N)))
    while N % batch_tile:
        batch_tile -= 1
    grid = N // batch_tile

    # ---- weight prep (wrapper-side, tiny) ------------------------------------
    # Stack the K taps into the contraction dim:
    #   W_stack[b, co, t*C + ci] = w_dil[b, co, ci, t]   -> (B, C, K*C)
    w_stack = jnp.transpose(w_dil, (0, 1, 3, 2)).reshape(
        block_size, C, kernel_size * C).astype(jnp.float32)
    w1_r = w1[:, :, 0].astype(jnp.float32)                        # (C, C)
    # Fold the 1x1 conv into the LAST dilated block (exact: the column mask
    # commutes with the left matmul).
    w_stack = w_stack.at[block_size - 1].set(w1_r @ w_stack[block_size - 1])
    b_fold = b_dil.astype(jnp.float32)
    b_fold = b_fold.at[block_size - 1].set(w1_r @ b_fold[block_size - 1])
    b_dil_r = b_fold[:, :, None]                                   # (B, C, 1)
    b1_r = b1.astype(jnp.float32)[:, None]                         # (C, 1)

    m_in = mask[:, 0:1, :]                                         # (N, 1, L)

    kernel = functools.partial(
        dilated_residual_block_kernel,
        block_size=block_size, ksize=kernel_size, dilation=dilation,
        pad=pad, batch_tile=batch_tile)

    out = pl.pallas_call(
        kernel,
        out_shape=jax.ShapeDtypeStruct((N, C, L), x.dtype),
        grid_spec=pltpu.PrefetchScalarGridSpec(
            num_scalar_prefetch=0,
            grid=(grid,),
            in_specs=[
                pl.BlockSpec((batch_tile, C, L), lambda g: (g, 0, 0)),
                pl.BlockSpec((batch_tile, 1, L), lambda g: (g, 0, 0)),
                pl.BlockSpec((block_size, C, kernel_size * C),
                             lambda g: (0, 0, 0)),
                pl.BlockSpec((block_size, C, 1), lambda g: (0, 0, 0)),
                pl.BlockSpec((C, 1), lambda g: (0, 0)),
            ],
            out_specs=pl.BlockSpec((batch_tile, C, L), lambda g: (g, 0, 0)),
        ),
        compiler_params=pltpu.CompilerParams(
            dimension_semantics=("parallel",)),
    )(x, m_in, w_stack, b_dil_r, b1_r)

    return out


def ref_forward(x, mask, w_dil, b_dil, w1, b1, *, kernel_size, dilation, block_size):
    """Pure-JAX reference matching the PyTorch forward (eval mode)."""
    pad = ((kernel_size - 1) // 2) * dilation
    m = mask[:, 0:1, :]
    out = x
    for b in range(block_size):
        out = jax.lax.conv_general_dilated(
            out, w_dil[b], window_strides=(1,), padding=[(pad, pad)],
            rhs_dilation=(dilation,),
            dimension_numbers=("NCH", "OIH", "NCH")) + b_dil[b][None, :, None]
        out = out * m
    out = jnp.einsum("oi,nil->nol", w1[:, :, 0], out) + b1[None, :, None]
    return (x + out) * m


if __name__ == "__main__":
    # Module config: kernel_size=3, dilation=2, in_channels=out_channels=8,
    # block_size=2 (residual add requires in_channels == out_channels).
    N, C, L = 2, 8, 128
    K, DIL, BSZ = 3, 2, 2

    key = jax.random.PRNGKey(0)
    ks = jax.random.split(key, 6)
    x = jax.random.normal(ks[0], (N, C, L), jnp.float32)
    mask = (jax.random.uniform(ks[1], (N, 2, L)) > 0.3).astype(jnp.float32)

    # deterministic parameter init (PyTorch-style uniform bounds)
    bound = 1.0 / (C * K) ** 0.5
    w_dil = jax.random.uniform(ks[2], (BSZ, C, C, K), jnp.float32, -bound, bound)
    b_dil = jax.random.uniform(ks[3], (BSZ, C), jnp.float32, -bound, bound)
    bound1 = 1.0 / C ** 0.5
    w1 = jax.random.uniform(ks[4], (C, C, 1), jnp.float32, -bound1, bound1)
    b1 = jax.random.uniform(ks[5], (C,), jnp.float32, -bound1, bound1)

    out = dilated_residual_block(x, mask, w_dil, b_dil, w1, b1,
                                 kernel_size=K, dilation=DIL, block_size=BSZ)
    out = jax.block_until_ready(out)

    ref = ref_forward(x, mask, w_dil, b_dil, w1, b1,
                      kernel_size=K, dilation=DIL, block_size=BSZ)
    assert out.shape == (N, C, L) and out.dtype == jnp.float32
    err = float(jnp.max(jnp.abs(out - ref)))
    assert jnp.allclose(out, ref, atol=2e-4, rtol=2e-4), err
    print("KERNEL_OK")
</pallas_src>

<mosaic_0001>
module attributes {stable_mosaic.version = 11 : i64} {
  func.func @dilated_residual_block_kernel(%arg0: i32, %arg1: memref<2x8x128xf32, #tpu.memory_space<vmem>>, %arg2: memref<2x1x128xf32, #tpu.memory_space<vmem>>, %arg3: memref<2x8x24xf32, #tpu.memory_space<vmem>>, %arg4: memref<2x8x1xf32, #tpu.memory_space<vmem>>, %arg5: memref<8x1xf32, #tpu.memory_space<vmem>>, %arg6: memref<2x8x128xf32, #tpu.memory_space<vmem>>) attributes {dimension_semantics = [#tpu.dimension_semantics<parallel>], iteration_bounds = array<i64: 1>, scalar_prefetch = 0 : i64, scratch_operands = 0 : i64, tpu.core_type = #tpu.core_type<tc>, window_params = [{transform_indices = @transform_0, window_bounds = array<i64: 2, 8, 128>}, {transform_indices = @transform_1, window_bounds = array<i64: 2, 1, 128>}, {pipeline_mode = #tpu.pipeline_mode<synchronous>, transform_indices = @transform_2, window_bounds = array<i64: 2, 8, 24>}, {pipeline_mode = #tpu.pipeline_mode<synchronous>, transform_indices = @transform_3, window_bounds = array<i64: 2, 8, 1>}, {pipeline_mode = #tpu.pipeline_mode<synchronous>, transform_indices = @transform_4, window_bounds = array<i64: 8, 1>}, {transform_indices = @transform_5, window_bounds = array<i64: 2, 8, 128>}]} {
    %0 = tpu.iota {dimensions = array<i32: 1>} : vector<8x128xi32>
    %c-2_i32 = arith.constant -2 : i32
    %1 = vector.broadcast %c-2_i32 : i32 to vector<8x128xi32>
    %2 = arith.addi %0, %1 : vector<8x128xi32>
    %c0_i32 = arith.constant 0 : i32
    %3 = vector.broadcast %c0_i32 : i32 to vector<8x128xi32>
    %4 = arith.cmpi sge, %2, %3 : vector<8x128xi32>
    %c-2_i32_0 = arith.constant -2 : i32
    %5 = vector.broadcast %c-2_i32_0 : i32 to vector<8x128xi32>
    %6 = arith.addi %0, %5 : vector<8x128xi32>
    %c128_i32 = arith.constant 128 : i32
    %7 = vector.broadcast %c128_i32 : i32 to vector<8x128xi32>
    %8 = arith.cmpi slt, %6, %7 : vector<8x128xi32>
    %9 = arith.andi %4, %8 : vector<8x128xi1>
    %c2_i32 = arith.constant 2 : i32
    %10 = vector.broadcast %c2_i32 : i32 to vector<8x128xi32>
    %11 = arith.addi %0, %10 : vector<8x128xi32>
    %c0_i32_1 = arith.constant 0 : i32
    %12 = vector.broadcast %c0_i32_1 : i32 to vector<8x128xi32>
    %13 = arith.cmpi sge, %11, %12 : vector<8x128xi32>
    %c2_i32_2 = arith.constant 2 : i32
    %14 = vector.broadcast %c2_i32_2 : i32 to vector<8x128xi32>
    %15 = arith.addi %0, %14 : vector<8x128xi32>
    %c128_i32_3 = arith.constant 128 : i32
    %16 = vector.broadcast %c128_i32_3 : i32 to vector<8x128xi32>
    %17 = arith.cmpi slt, %15, %16 : vector<8x128xi32>
    %18 = arith.andi %13, %17 : vector<8x128xi1>
    %c0 = arith.constant 0 : index
    %c0_4 = arith.constant 0 : index
    %c0_5 = arith.constant 0 : index
    %19 = vector.load %arg3[%c0, %c0_4, %c0_5] : memref<2x8x24xf32, #tpu.memory_space<vmem>>, vector<1x8x24xf32>
    %20 = vector.shape_cast %19 : vector<1x8x24xf32> to vector<8x24xf32>
    %c1 = arith.constant 1 : index
    %c0_6 = arith.constant 0 : index
    %c0_7 = arith.constant 0 : index
    %21 = vector.load %arg3[%c1, %c0_6, %c0_7] : memref<2x8x24xf32, #tpu.memory_space<vmem>>, vector<1x8x24xf32>
    %22 = vector.shape_cast %21 : vector<1x8x24xf32> to vector<8x24xf32>
    %c0_8 = arith.constant 0 : index
    %c0_9 = arith.constant 0 : index
    %c0_10 = arith.constant 0 : index
    %23 = vector.load %arg4[%c0_8, %c0_9, %c0_10] : memref<2x8x1xf32, #tpu.memory_space<vmem>>, vector<1x8x1xf32>
    %24 = vector.shape_cast %23 : vector<1x8x1xf32> to vector<8x1xf32>
    %25 = vector.shape_cast %24 : vector<8x1xf32> to vector<8x1xf32>
    %26 = vector.broadcast %25 : vector<8x1xf32> to vector<8x128xf32>
    %c1_11 = arith.constant 1 : index
    %c0_12 = arith.constant 0 : index
    %c0_13 = arith.constant 0 : index
    %27 = vector.load %arg4[%c1_11, %c0_12, %c0_13] : memref<2x8x1xf32, #tpu.memory_space<vmem>>, vector<1x8x1xf32>
    %28 = vector.shape_cast %27 : vector<1x8x1xf32> to vector<8x1xf32>
    %29 = vector.shape_cast %28 : vector<8x1xf32> to vector<8x1xf32>
    %30 = vector.broadcast %29 : vector<8x1xf32> to vector<8x128xf32>
    %c0_14 = arith.constant 0 : index
    %c0_15 = arith.constant 0 : index
    %31 = vector.load %arg5[%c0_14, %c0_15] : memref<8x1xf32, #tpu.memory_space<vmem>>, vector<8x1xf32>
    %32 = vector.shape_cast %31 : vector<8x1xf32> to vector<8x1xf32>
    %33 = vector.broadcast %32 : vector<8x1xf32> to vector<8x128xf32>
    %c0_16 = arith.constant 0 : index
    %c0_17 = arith.constant 0 : index
    %c0_18 = arith.constant 0 : index
    %34 = vector.load %arg1[%c0_16, %c0_17, %c0_18] : memref<2x8x128xf32, #tpu.memory_space<vmem>>, vector<1x8x128xf32>
    %35 = vector.shape_cast %34 : vector<1x8x128xf32> to vector<8x128xf32>
    %c0_19 = arith.constant 0 : index
    %c0_20 = arith.constant 0 : index
    %c0_21 = arith.constant 0 : index
    %36 = vector.load %arg2[%c0_19, %c0_20, %c0_21] : memref<2x1x128xf32, #tpu.memory_space<vmem>>, vector<1x1x128xf32>
    %37 = vector.shape_cast %36 : vector<1x1x128xf32> to vector<1x128xf32>
    %38 = vector.shape_cast %37 : vector<1x128xf32> to vector<1x128xf32>
    %39 = vector.broadcast %38 : vector<1x128xf32> to vector<8x128xf32>
    %c2_i32_22 = arith.constant 2 : i32
    %40 = tpu.dynamic_rotate %35 by %c2_i32_22 dim 1 : vector<8x128xf32>, i32 -> vector<8x128xf32>
    %cst = arith.constant 0.000000e+00 : f32
    %41 = vector.broadcast %cst : f32 to vector<8x128xf32>
    %42 = arith.select %9, %40, %41 : vector<8x128xi1>, vector<8x128xf32>
    %c126_i32 = arith.constant 126 : i32
    %43 = tpu.dynamic_rotate %35 by %c126_i32 dim 1 : vector<8x128xf32>, i32 -> vector<8x128xf32>
    %cst_23 = arith.constant 0.000000e+00 : f32
    %44 = vector.broadcast %cst_23 : f32 to vector<8x128xf32>
    %45 = arith.select %18, %43, %44 : vector<8x128xi1>, vector<8x128xf32>
    %46 = tpu.concatenate %42, %35, %45 in 0 : vector<8x128xf32>, vector<8x128xf32>, vector<8x128xf32> -> vector<24x128xf32>
    %cst_24 = arith.constant dense<0.000000e+00> : vector<8x128xf32>
    %47 = tpu.matmul %20, %46, %cst_24 {dimension_numbers = #tpu.dot_dimension_numbers<[1], [0], [0], [1], [0, 0, 1, 1], [], []>} : vector<8x24xf32>, vector<24x128xf32>, vector<8x128xf32> -> vector<8x128xf32>
    %48 = arith.addf %47, %26 : vector<8x128xf32>
    %49 = arith.mulf %48, %39 : vector<8x128xf32>
    %c2_i32_25 = arith.constant 2 : i32
    %50 = tpu.dynamic_rotate %49 by %c2_i32_25 dim 1 : vector<8x128xf32>, i32 -> vector<8x128xf32>
    %cst_26 = arith.constant 0.000000e+00 : f32
    %51 = vector.broadcast %cst_26 : f32 to vector<8x128xf32>
    %52 = arith.select %9, %50, %51 : vector<8x128xi1>, vector<8x128xf32>
    %c126_i32_27 = arith.constant 126 : i32
    %53 = tpu.dynamic_rotate %49 by %c126_i32_27 dim 1 : vector<8x128xf32>, i32 -> vector<8x128xf32>
    %cst_28 = arith.constant 0.000000e+00 : f32
    %54 = vector.broadcast %cst_28 : f32 to vector<8x128xf32>
    %55 = arith.select %18, %53, %54 : vector<8x128xi1>, vector<8x128xf32>
    %56 = tpu.concatenate %52, %49, %55 in 0 : vector<8x128xf32>, vector<8x128xf32>, vector<8x128xf32> -> vector<24x128xf32>
    %cst_29 = arith.constant dense<0.000000e+00> : vector<8x128xf32>
    %57 = tpu.matmul %22, %56, %cst_29 {dimension_numbers = #tpu.dot_dimension_numbers<[1], [0], [0], [1], [0, 0, 1, 1], [], []>} : vector<8x24xf32>, vector<24x128xf32>, vector<8x128xf32> -> vector<8x128xf32>
    %58 = arith.addf %57, %30 : vector<8x128xf32>
    %59 = arith.mulf %58, %39 : vector<8x128xf32>
    %60 = arith.addf %35, %59 : vector<8x128xf32>
    %61 = arith.addf %60, %33 : vector<8x128xf32>
    %62 = arith.mulf %61, %39 : vector<8x128xf32>
    %c0_30 = arith.constant 0 : index
    %c0_31 = arith.constant 0 : index
    %c0_32 = arith.constant 0 : index
    %63 = vector.load %arg6[%c0_30, %c0_31, %c0_32] : memref<2x8x128xf32, #tpu.memory_space<vmem>>, vector<1x8x128xf32>
    %64 = vector.shape_cast %63 : vector<1x8x128xf32> to vector<8x128xf32>
    %65 = vector.shape_cast %62 : vector<8x128xf32> to vector<1x8x128xf32>
    tpu.vector_store %arg6[%c0_30, %c0_31, %c0_32], %65 {strides = array<i32>} : memref<2x8x128xf32, #tpu.memory_space<vmem>>, vector<1x8x128xf32>,
    %c1_33 = arith.constant 1 : index
    %c0_34 = arith.constant 0 : index
    %c0_35 = arith.constant 0 : index
    %66 = vector.load %arg1[%c1_33, %c0_34, %c0_35] : memref<2x8x128xf32, #tpu.memory_space<vmem>>, vector<1x8x128xf32>
    %67 = vector.shape_cast %66 : vector<1x8x128xf32> to vector<8x128xf32>
    %c1_36 = arith.constant 1 : index
    %c0_37 = arith.constant 0 : index
    %c0_38 = arith.constant 0 : index
    %68 = vector.load %arg2[%c1_36, %c0_37, %c0_38] : memref<2x1x128xf32, #tpu.memory_space<vmem>>, vector<1x1x128xf32>
    %69 = vector.shape_cast %68 : vector<1x1x128xf32> to vector<1x128xf32>
    %70 = vector.shape_cast %69 : vector<1x128xf32> to vector<1x128xf32>
    %71 = vector.broadcast %70 : vector<1x128xf32> to vector<8x128xf32>
    %c2_i32_39 = arith.constant 2 : i32
    %72 = tpu.dynamic_rotate %67 by %c2_i32_39 dim 1 : vector<8x128xf32>, i32 -> vector<8x128xf32>
    %cst_40 = arith.constant 0.000000e+00 : f32
    %73 = vector.broadcast %cst_40 : f32 to vector<8x128xf32>
    %74 = arith.select %9, %72, %73 : vector<8x128xi1>, vector<8x128xf32>
    %c126_i32_41 = arith.constant 126 : i32
    %75 = tpu.dynamic_rotate %67 by %c126_i32_41 dim 1 : vector<8x128xf32>, i32 -> vector<8x128xf32>
    %cst_42 = arith.constant 0.000000e+00 : f32
    %76 = vector.broadcast %cst_42 : f32 to vector<8x128xf32>
    %77 = arith.select %18, %75, %76 : vector<8x128xi1>, vector<8x128xf32>
    %78 = tpu.concatenate %74, %67, %77 in 0 : vector<8x128xf32>, vector<8x128xf32>, vector<8x128xf32> -> vector<24x128xf32>
    %cst_43 = arith.constant dense<0.000000e+00> : vector<8x128xf32>
    %79 = tpu.matmul %20, %78, %cst_43 {dimension_numbers = #tpu.dot_dimension_numbers<[1], [0], [0], [1], [0, 0, 1, 1], [], []>} : vector<8x24xf32>, vector<24x128xf32>, vector<8x128xf32> -> vector<8x128xf32>
    %80 = arith.addf %79, %26 : vector<8x128xf32>
    %81 = arith.mulf %80, %71 : vector<8x128xf32>
    %c2_i32_44 = arith.constant 2 : i32
    %82 = tpu.dynamic_rotate %81 by %c2_i32_44 dim 1 : vector<8x128xf32>, i32 -> vector<8x128xf32>
    %cst_45 = arith.constant 0.000000e+00 : f32
    %83 = vector.broadcast %cst_45 : f32 to vector<8x128xf32>
    %84 = arith.select %9, %82, %83 : vector<8x128xi1>, vector<8x128xf32>
    %c126_i32_46 = arith.constant 126 : i32
    %85 = tpu.dynamic_rotate %81 by %c126_i32_46 dim 1 : vector<8x128xf32>, i32 -> vector<8x128xf32>
    %cst_47 = arith.constant 0.000000e+00 : f32
    %86 = vector.broadcast %cst_47 : f32 to vector<8x128xf32>
    %87 = arith.select %18, %85, %86 : vector<8x128xi1>, vector<8x128xf32>
    %88 = tpu.concatenate %84, %81, %87 in 0 : vector<8x128xf32>, vector<8x128xf32>, vector<8x128xf32> -> vector<24x128xf32>
    %cst_48 = arith.constant dense<0.000000e+00> : vector<8x128xf32>
    %89 = tpu.matmul %22, %88, %cst_48 {dimension_numbers = #tpu.dot_dimension_numbers<[1], [0], [0], [1], [0, 0, 1, 1], [], []>} : vector<8x24xf32>, vector<24x128xf32>, vector<8x128xf32> -> vector<8x128xf32>
    %90 = arith.addf %89, %30 : vector<8x128xf32>
    %91 = arith.mulf %90, %71 : vector<8x128xf32>
    %92 = arith.addf %67, %91 : vector<8x128xf32>
    %93 = arith.addf %92, %33 : vector<8x128xf32>
    %94 = arith.mulf %93, %71 : vector<8x128xf32>
    %c1_49 = arith.constant 1 : index
    %c0_50 = arith.constant 0 : index
    %c0_51 = arith.constant 0 : index
    %95 = vector.load %arg6[%c1_49, %c0_50, %c0_51] : memref<2x8x128xf32, #tpu.memory_space<vmem>>, vector<1x8x128xf32>
    %96 = vector.shape_cast %95 : vector<1x8x128xf32> to vector<8x128xf32>
    %97 = vector.shape_cast %94 : vector<8x128xf32> to vector<1x8x128xf32>
    tpu.vector_store %arg6[%c1_49, %c0_50, %c0_51], %97 {strides = array<i32>} : memref<2x8x128xf32, #tpu.memory_space<vmem>>, vector<1x8x128xf32>,
    return
  }
  func.func @transform_0(%arg0: i32) -> (i32, i32, i32) {
    %c0_i32 = arith.constant 0 : i32
    %c0_i32_0 = arith.constant 0 : i32
    %c0_i32_1 = arith.constant 0 : i32
    return %arg0, %c0_i32, %c0_i32_0 : i32, i32, i32
  }
  func.func @transform_1(%arg0: i32) -> (i32, i32, i32) {
    %c0_i32 = arith.constant 0 : i32
    %c0_i32_0 = arith.constant 0 : i32
    %c0_i32_1 = arith.constant 0 : i32
    return %arg0, %c0_i32, %c0_i32_0 : i32, i32, i32
  }
  func.func @transform_2(%arg0: i32) -> (i32, i32, i32) {
    %c0_i32 = arith.constant 0 : i32
    %c0_i32_0 = arith.constant 0 : i32
    %c0_i32_1 = arith.constant 0 : i32
    %c0_i32_2 = arith.constant 0 : i32
    return %c0_i32, %c0_i32_0, %c0_i32_1 : i32, i32, i32
  }
  func.func @transform_3(%arg0: i32) -> (i32, i32, i32) {
    %c0_i32 = arith.constant 0 : i32
    %c0_i32_0 = arith.constant 0 : i32
    %c0_i32_1 = arith.constant 0 : i32
    %c0_i32_2 = arith.constant 0 : i32
    return %c0_i32, %c0_i32_0, %c0_i32_1 : i32, i32, i32
  }
  func.func @transform_4(%arg0: i32) -> (i32, i32) {
    %c0_i32 = arith.constant 0 : i32
    %c0_i32_0 = arith.constant 0 : i32
    %c0_i32_1 = arith.constant 0 : i32
    return %c0_i32, %c0_i32_0 : i32, i32
  }
  func.func @transform_5(%arg0: i32) -> (i32, i32, i32) {
    %c0_i32 = arith.constant 0 : i32
    %c0_i32_0 = arith.constant 0 : i32
    %c0_i32_1 = arith.constant 0 : i32
    return %arg0, %c0_i32, %c0_i32_0 : i32, i32, i32
  }
}

</mosaic_0001>

<bundles_post_ra>
// kernel: tpu_custom_call.1
= control target key start
LH: loop header
LB: loop body
LE: loop exit
PB: predicated region body
PF: predicated region fallthrough
CT: control target
= control target key end

     0   :  { %s533_s22 = smov 2   ;;  %v534_v2 = vmov 0.0|0.0   ;;  %vm535_vm0 = vmmov 0   ;;  %v536_v3 = vmov 0.0   ;;  %s668_s0 = inlined_call_operand.vmem [shape: f32[2,8,128], index: 0, kind: input, shape index: {}]   ;;  %s669_s1 = inlined_call_operand.vmem [shape: f32[2,1,128], index: 1, kind: input, shape index: {}]   ;;  %s670_s2 = inlined_call_operand.vmem [shape: f32[2,8,24], index: 2, kind: input, shape index: {}]   ;;  %s671_s3 = inlined_call_operand.vmem [shape: f32[2,8,1], index: 3, kind: input, shape index: {}]   ;;  %s672_s4 = inlined_call_operand.vmem [shape: f32[8,1], index: 4, kind: input, shape index: {}]   ;;  %s673_s5 = inlined_call_operand.hbm [shape: f32[2,8,128], index: 5, kind: output, shape index: {}]  }
   0x1   :  { %v576_v0 = vld [vmem:[%s668_s0] sm:$0xff]  ;;  %v581_v1 = vld [vmem:[%s668_s0 + $0x8] sm:$0xff]  ;;  %481 = vmatprep.subr.bf16.mxu0 %v534_v2  ;;  %451 = vmatprep.mubr.msk.f32.mxu0 %vm535_vm0, %v536_v3 }
   0x2   :  { %61 = vrot.lane.b32.xlu0 %v576_v0, %s533_s22  ;;  %236 = vrot.lane.b32.xlu1 %v581_v1, %s533_s22 }
   0x3   :  { %10 = vsyncpa [#allocation3], 0  ;;  %v537_v4 = vmov 0   ;;  %485 = vmatprep.subr.bf16.mxu1 %v534_v2  ;;  %460 = vmatprep.mubr.msk.f32.mxu1 %vm535_vm0, %v536_v3  ;;  %s538_s0 = smov 126   ;;  %v34_v5 = vld [vmem:[%s671_s3] sm:$0xff]  ;;  %v21_v6 = vlaneseq  ;;  %vm539_vm2 = vmmov 1  }
   0x4   :  { %507 = vset.pattern.permute.xlu0 %v537_v4  ;;  %508 = vset.pattern.permute.xlu1 %v537_v4  ;;  %v31_v16 = vld [vmem:[%s670_s2] sm:$0xff]  ;;  %vm67_vm5 = vcmask 195584   ;;  %v412_v29 = vld [vmem:[%s671_s3 + $0x8] sm:$0xff] }
   0x5   :  { %v22_v7 = vand.u32 127, %v21_v6  ;;  %v413_v19 = vld [vmem:[%s669_s1] ss:$0 sm:$0xff]  ;;  %v422_v24 = vld [vmem:[%s669_s1 + $0x1] ss:$0 sm:$0xff]  ;;  %v411_v33 = vld [vmem:[%s670_s2 + $0x8] sm:$0xff] }
   0x6   :  { %64 = vrot.lane.b32.xlu0 %v576_v0, %s538_s0  ;;  %239 = vrot.lane.b32.xlu1 %v581_v1, %s538_s0  ;;  %v47_v30 = vld [vmem:[%s672_s4] sm:$0xff]  ;;  %s540_s2 = smov [#allocation2]  }
   0x7   :  { %v23_v8 = vadd.s32 4294967294, %v22_v7  ;;  %v27_v11 = vadd.s32 2, %v22_v7  ;;  %s400_s3 = sshll.u32 %s540_s2, 4  ;;  %s401_s3 = int_to_ptr.vmem [resolvable:$true] %s400_s3 }
   0x8   :  { %s509_s4 = scalar_lea.vmem %s401_s3, 256  ;;  %p514_p1 = scmp.lt.s32.totalorder %s401_s3, %s401_s3 }
   0x9   :  { %vm24_vm1 = vcmp.ge.s32.totalorder %v23_v8, 0  ;;  %vm29_vm4 = vcmp.lt.s32.totalorder %v27_v11, 128  ;;  %p510_p0 = scmp.ne.s32.totalorder %s401_s3, %s509_s4  ;;  %p515_p2 = scmp.lt.s32.totalorder %s509_s4, %s509_s4 }
   0xa   :  { %37 = vperm.xlu0 %507, %v34_v5   ;;  %vm600_vm3 = vmpackc.low %vm539_vm2, %vm24_vm1 }
   0xb   :  { %p516_p3 = por %p515_p2, %p514_p1 }
   0xd   :  { %p517_p4 = pnand %p516_p3, %p510_p0 }
  0x74   :  { %v62_v9 = vpop.permute.xlu0 %61  ;;  %v237_v13 = vpop.permute.xlu1 %236 }
  0x75   :  { %v482_v12 = vpack.c.bf16 %v576_v0, %v62_v9  ;;  %v490_v15 = vpack.c.bf16 %v581_v1, %v237_v13 }
  0x77   :  { %484 = vmatpush3.bf16.msk.msra.mxu0 %vm600_vm3, %v482_v12 }
  0x78   :  { %v65_v14 = vpop.permute.xlu0 %64  ;;  %449 = vmatprep.subr.mxu0 %v536_v3  ;;  %v240_v17 = vpop.permute.xlu1 %239 }
  0x7b   :  { %450 = vmatpush3.msk.msra.mxu0 %vm29_vm4, %v65_v14 }
  0x7c   :  { %452 = vmatmul.mubr.msk.f32.vlgmr.msra.gmra.mrb[0].mxu0 %vm67_vm5, %v31_v16  ;;  %489 = vmatprep.subr.bf16.mxu0 %v534_v2 }
  0x7d   :  { %492 = vmatpush3.bf16.msk.msra.mxu0 %vm600_vm3, %v490_v15  ;;  %469 = vmatprep.mubr.msk.f32.mxu0 %vm535_vm0, %v536_v3 }
  0x7e   :  { %467 = vmatprep.subr.mxu0 %v536_v3 }
  0x81   :  { %468 = vmatpush3.msk.msra.mxu0 %vm29_vm4, %v240_v17 }
  0x82   :  { %470 = vmatmul.mubr.msk.f32.vlgmr.msra.gmra.mrb[2].mxu0 %vm67_vm5, %v31_v16 }
  0x89   :  { %v38_v18 = vpop.permute.xlu0 %37 }
 0x14f   :  { %v137_v20 = vpop.f32.mrb[0].mxu0 }
 0x150   :  { %v138_v21 = vadd.f32 %v137_v20, %v38_v18  ;;  %v453_v22 = vpop.f32.mrb[1].mxu0 }
 0x152   :  { %v141_v23 = vmul.f32 %v413_v19, %v138_v21 }
 0x154   :  { %142 = vrot.lane.b32.xlu1 %v141_v23, %s533_s22 }
 0x155   :  { %v308_v25 = vpop.f32.mrb[2].mxu0 }
 0x156   :  { %v309_v26 = vadd.f32 %v308_v25, %v38_v18  ;;  %v471_v27 = vpop.f32.mrb[3].mxu0 }
 0x158   :  { %v312_v28 = vmul.f32 %v422_v24, %v309_v26  ;;  %145 = vrot.lane.b32.xlu1 %v141_v23, %s538_s0 }
 0x15a   :  { %313 = vrot.lane.b32.xlu0 %v312_v28, %s533_s22 }
 0x15c   :  { %316 = vrot.lane.b32.xlu1 %v312_v28, %s538_s0 }
 0x15e   :  { %44 = vperm.xlu0 %507, %v412_v29  }
 0x160   :  { %50 = vperm.xlu1 %508, %v47_v30  }
 0x1c6   :  { %v143_v31 = vpop.permute.xlu1 %142 }
 0x1c7   :  { %v486_v32 = vpack.c.bf16 %v141_v23, %v143_v31 }
 0x1c9   :  { %488 = vmatpush3.bf16.msk.msra.mxu1 %vm600_vm3, %v486_v32 }
 0x1ca   :  { %458 = vmatprep.subr.mxu1 %v536_v3  ;;  %v146_v34 = vpop.permute.xlu1 %145 }
 0x1cc   :  { %v314_v35 = vpop.permute.xlu0 %313 }
 0x1cd   :  { %v494_v36 = vpack.c.bf16 %v312_v28, %v314_v35  ;;  %459 = vmatpush3.msk.msra.mxu1 %vm29_vm4, %v146_v34 }
 0x1ce   :  { %461 = vmatmul.mubr.msk.f32.vlgmr.msra.gmra.mrb[0].mxu1 %vm67_vm5, %v411_v33  ;;  %493 = vmatprep.subr.bf16.mxu1 %v534_v2  ;;  %v317_v37 = vpop.permute.xlu1 %316 }
 0x1cf   :  { %496 = vmatpush3.bf16.msk.msra.mxu1 %vm600_vm3, %v494_v36  ;;  %478 = vmatprep.mubr.msk.f32.mxu1 %vm535_vm0, %v536_v3 }
 0x1d0   :  { %476 = vmatprep.subr.mxu1 %v536_v3 }
 0x1d3   :  { %477 = vmatpush3.msk.msra.mxu1 %vm29_vm4, %v317_v37 }
 0x1d4   :  { %479 = vmatmul.mubr.msk.f32.vlgmr.msra.gmra.mrb[2].mxu1 %vm67_vm5, %v411_v33 }
 0x1dd   :  { %v45_v38 = vpop.permute.xlu0 %44 }
 0x1df   :  { %v51_v43 = vpop.permute.xlu1 %50 }
 0x2a1   :  { %v217_v39 = vpop.f32.mrb[0].mxu1 }
 0x2a2   :  { %v218_v40 = vadd.f32 %v217_v39, %v45_v38  ;;  %v462_v41 = vpop.f32.mrb[1].mxu1 }
 0x2a4   :  { %v221_v42 = vmul.f32 %v413_v19, %v218_v40 }
 0x2a6   :  { %v222_v44 = vadd.f32 %v221_v42, %v576_v0 }
 0x2a7   :  { %v385_v45 = vpop.f32.mrb[2].mxu1 }
 0x2a8   :  { %v223_v46 = vadd.f32 %v222_v44, %v51_v43  ;;  %v386_v47 = vadd.f32 %v385_v45, %v45_v38  ;;  %v480_v48 = vpop.f32.mrb[3].mxu1 }
 0x2aa   :  { %v224_v49 = vmul.f32 %v413_v19, %v223_v46  ;;  %v389_v50 = vmul.f32 %v422_v24, %v386_v47 }
 0x2ac   :  { %225 = vst [vmem:[#allocation2] sm:$0xff] %v224_v49  ;;  %v390_v51 = vadd.f32 %v581_v1, %v389_v50 }
 0x2ae   :  { %v391_v52 = vadd.f32 %v390_v51, %v51_v43 }
 0x2b0   :  { %v392_v53 = vmul.f32 %v422_v24, %v391_v52 }
 0x2b2   :  { %394 = vst [vmem:[#allocation2 + $0x8] sm:$0xff] %v392_v53 }
 0x2b3   :  { %520 = shalt.err (!%p517_p4)
}
 0x2b4   :  { %s521_s13 = scalar_lea.hbm %s673_s5, 256 }
 0x2b5   :  { %p522_p5 = scmp.ne.s32.totalorder %s673_s5, %s521_s13  ;;  %p525_p6 = scmp.lt.u32.totalorder %s521_s13, %s673_s5 }
 0x2b7   :  { %p527_p7 = pnand %p525_p6, %p522_p5 }
 0x2b9   :  { %530 = shalt.err (!%p527_p7)
}
 0x2ba   :  { %s541_s18 = smov 128   ;;  %s542_s19 = smov 8  }
 0x2bb   :  { %406 = dma.vmem_to_hbm [thread:$0]  %s401_s3, 256, %s673_s5, [#allocation3], %s541_s18, %s541_s18, %s542_s19  }
 0x2bc   :  { %531 = dma.done.wait [#allocation3], 256  }
 0x2bd   :  { %532 = vsyncadd [#allocation3], 4294967040 }
 0x2be   :  { %410 = vsyncpa [#allocation3], 1 }

</bundles_post_ra>
